<compile_context>
chip_gen: v5e
topology: v5e:2x2
jax: 0.10.0
libtpu: 0.0.40
codegen_flags: <defaults>
</compile_context>

<pallas_src>
import functools

import jax
import jax.numpy as jnp
from jax import lax
from jax.experimental import pallas as pl
from jax.experimental.pallas import tpu as pltpu


# ----------------------------------------------------------------------------
# Generation-aware sizing helpers
# ----------------------------------------------------------------------------
def _round_up(x, m):
    return ((x + m - 1) // m) * m


def _tpu_vmem_budgets():
    """(vmem_limit_bytes, streamed_tile_budget_bytes) per TPU generation."""
    try:
        phys = int(getattr(pltpu.get_tpu_info(), "vmem_capacity_bytes", 64 << 20))
    except Exception:
        phys = 64 << 20                       # conservative: v7x-sized VMEM
    # v7x (64 MiB phys)  -> 48 MiB scoped limit, 40 MiB streamed-tile budget
    # v5e/v6e (128 MiB)  -> 96 MiB scoped limit, 64 MiB streamed-tile budget
    limit = min((phys * 3) // 4, 96 << 20)
    budget = min(limit - (8 << 20), 64 << 20)
    return limit, budget


def _row_axis_semantics():
    """Semantics for the row-tile grid axis.

    On v7x (2 TensorCores/chip) plain PARALLEL has been measured not to change
    codegen; CORE_PARALLEL actually shards row tiles across both cores' HBM
    paths (~2x effective bandwidth for this streaming op).  Single-TC v5e/v6e
    keep PARALLEL (identical codegen, well-trodden path).
    """
    try:
        kind = jax.devices()[0].device_kind.lower()
    except Exception:
        kind = ""
    if ("v7" in kind) or ("tpu7" in kind):
        return getattr(pltpu, "CORE_PARALLEL", pltpu.PARALLEL)
    return pltpu.PARALLEL


def _pick_fused_row_tile(d, vtot, n_rows, *, max_tile=8192):
    """Row tile for the fused-gather kernel (multiple of 128)."""
    # Streamed bytes per row are tiny (3 ids + score, double-buffered); the
    # real bound is in-kernel intermediates: the (Vtot, rt) selection matrix
    # and the (D, rt) f32 matmul result, which spill to VMEM when large.
    per_row = 2 * (3 * 4 + 4) + 2 * 4 * vtot + 3 * 4 * d
    budget = 8 << 20
    tile = max(128, (budget // per_row) // 128 * 128)
    tile = min(tile, max_tile)
    tile = min(tile, _round_up(max(int(n_rows), 1), 128))
    return int(tile)


def _pick_gathered_row_tile(d, itemsize, n_rows, *, budget, max_tile=16384):
    """Row tile for the XLA-gather fallback kernel (multiple of 128)."""
    # 3 streamed inputs x 2 pipeline buffers x (row_tile * D * itemsize)
    #   + double-buffered (row_tile, 1) f32 output block
    #   + ~4 f32 value copies (h, t, r, diff) that may spill to VMEM.
    per_row = 3 * 2 * d * itemsize + 2 * 4 + 4 * 4 * d
    tile = max(128, (budget // per_row) // 128 * 128)
    tile = min(tile, max_tile)
    tile = min(tile, _round_up(max(int(n_rows), 1), 128))
    return int(tile)


# ----------------------------------------------------------------------------
# Kernel 1: fused gather + score.  Rows live on the LANE axis; output is a
# lane-dense (1, row_tile) block.
# ----------------------------------------------------------------------------
def _fused_transe_kernel(table_ref, hid_ref, tid_ref, rid_ref, o_ref, *,
                         use_l1: bool, node_vocab: int):
    """table_ref: (D, Vn+Vr) resident VMEM block = [node_emb.T | rela_emb.T]
       *_id refs: (1, row_tile) int32 blocks;  o_ref: (1, row_tile) f32."""
    table = table_ref[...]                               # (D, V) param dtype
    vtot = table.shape[1]
    rt = o_ref.shape[-1]
    dt = table.dtype

    iota = lax.broadcasted_iota(jnp.int32, (vtot, rt), 0)
    # Selection matrix S with entries in {-1, 0, +1}:
    #   diff[:, r] = table @ S[:, r] = node[h_r] - node[t_r] + rela[rel_r]
    sel = ((iota == hid_ref[...]).astype(dt)
           - (iota == tid_ref[...]).astype(dt)
           + (iota == (rid_ref[...] + node_vocab)).astype(dt))      # (V, rt)

    # f32 tables need HIGHEST precision so the MXU selection is exact.
    precision = lax.Precision.HIGHEST if table.dtype == jnp.float32 else None
    diff = jnp.dot(table, sel, preferred_element_type=jnp.float32,
                   precision=precision)                              # (D, rt) MXU

    if use_l1:
        norm = jnp.sum(jnp.abs(diff), axis=0, keepdims=True)         # (1, rt)
    else:
        norm = jnp.sqrt(jnp.sum(diff * diff, axis=0, keepdims=True))
    o_ref[...] = -norm                                               # lane-dense vst


def transe_scores_fused(comb_table_T, h_ids, t_ids, r_ids, *, node_vocab,
                        trans_score="l2", row_tile=None):
    """comb_table_T: (D, Vn+Vr); h/t/r_ids: (R,) int32 -> (R,) f32 scores."""
    D, V = comb_table_T.shape
    R = int(h_ids.shape[0])
    vmem_limit, _ = _tpu_vmem_budgets()
    if row_tile is None:
        row_tile = _pick_fused_row_tile(D, V, R)
    n_tiles = pl.cdiv(R, row_tile)
    r_pad = n_tiles * row_tile

    def pad_ids(ids):
        ids = ids.astype(jnp.int32)
        if r_pad != R:                         # pad only the cheap id vectors
            ids = jnp.pad(ids, (0, r_pad - R))
        return ids.reshape(1, r_pad)

    h2, t2, r2 = pad_ids(h_ids), pad_ids(t_ids), pad_ids(r_ids)

    kernel = functools.partial(_fused_transe_kernel,
                               use_l1=(trans_score == "l1"),
                               node_vocab=int(node_vocab))
    out = pl.pallas_call(
        kernel,
        out_shape=jax.ShapeDtypeStruct((1, r_pad), jnp.float32),
        grid=(n_tiles,),
        in_specs=[
            pl.BlockSpec((D, V), lambda i: (0, 0)),          # table: resident
            pl.BlockSpec((1, row_tile), lambda i: (0, i)),   # head ids
            pl.BlockSpec((1, row_tile), lambda i: (0, i)),   # tail ids
            pl.BlockSpec((1, row_tile), lambda i: (0, i)),   # rela ids
        ],
        out_specs=pl.BlockSpec((1, row_tile), lambda i: (0, i)),
        compiler_params=pltpu.CompilerParams(
            dimension_semantics=(_row_axis_semantics(),),
            vmem_limit_bytes=vmem_limit,
        ),
    )(comb_table_T, h2, t2, r2)
    return out[0, :R]


# ----------------------------------------------------------------------------
# Kernel 2: fallback for large vocabularies.  Consumes pre-gathered slabs in
# their NATURAL (rows, D) layout (no HBM transpose) and reduces over the D
# lane axis; the (row_tile, 1) output is negligible traffic vs the inputs.
# ----------------------------------------------------------------------------
def _gathered_transe_kernel(h_ref, t_ref, r_ref, o_ref, *, use_l1: bool):
    h = h_ref[...].astype(jnp.float32)                   # (rt, D)
    t = t_ref[...].astype(jnp.float32)
    r = r_ref[...].astype(jnp.float32)
    diff = h + r - t                                     # VPU
    # TODO(synk): for D >= ~512 loop over D-chunks into a (rt, 1) accumulator
    # to bound live vregs (review item); unnecessary at typical embedding dims.
    if use_l1:
        red = jnp.sum(jnp.abs(diff), axis=1, keepdims=True)          # (rt, 1)
    else:
        red = jnp.sqrt(jnp.sum(diff * diff, axis=1, keepdims=True))
    o_ref[...] = -red


def transe_scores_gathered(heads, tails, relas, *, trans_score="l2", row_tile=None):
    """heads/tails/relas: (R, D) gathered embeddings -> (R,) f32 scores."""
    R, D = heads.shape
    itemsize = jnp.dtype(heads.dtype).itemsize
    vmem_limit, tile_budget = _tpu_vmem_budgets()
    if row_tile is None:
        row_tile = _pick_gathered_row_tile(D, itemsize, R, budget=tile_budget)
    if row_tile >= R:
        row_tile = R                     # single full-array block (always legal)
    n_tiles = pl.cdiv(R, row_tile)
    # No jnp.pad of the slabs: a partial final block is handled by the cdiv
    # grid; out-of-range output rows are never written.

    kernel = functools.partial(_gathered_transe_kernel,
                               use_l1=(trans_score == "l1"))
    # NOTE: pipeline_mode=pl.Buffered(3) on the three inputs is worth a sweep
    # once tiles exceed ~4 MiB and VMEM headroom allows.
    out = pl.pallas_call(
        kernel,
        out_shape=jax.ShapeDtypeStruct((R, 1), jnp.float32),
        grid=(n_tiles,),
        in_specs=[
            pl.BlockSpec((row_tile, D), lambda i: (i, 0)),   # heads
            pl.BlockSpec((row_tile, D), lambda i: (i, 0)),   # tails
            pl.BlockSpec((row_tile, D), lambda i: (i, 0)),   # relas
        ],
        out_specs=pl.BlockSpec((row_tile, 1), lambda i: (i, 0)),
        compiler_params=pltpu.CompilerParams(
            dimension_semantics=(_row_axis_semantics(),),
            vmem_limit_bytes=vmem_limit,
        ),
    )(heads, tails, relas)
    return out[:, 0]


# ----------------------------------------------------------------------------
# Model wrapper (forward pass of RelaTransEModel)
# ----------------------------------------------------------------------------
class RelaTransEModelPallas:
    def __init__(self, node_vocab_size, node_embed_dim, rela_size, rela_embed_dim,
                 trans_score="l2", param_dtype=jnp.bfloat16, key=None,
                 max_fused_vocab=512):
        assert node_embed_dim == rela_embed_dim, "TransE requires matching dims"
        if key is None:
            key = jax.random.PRNGKey(0)
        k_node, k_rela = jax.random.split(key)

        def xavier_uniform(k, fan_out, fan_in):
            bound = (6.0 / (fan_in + fan_out)) ** 0.5
            return jax.random.uniform(k, (fan_out, fan_in), jnp.float32, -bound, bound)

        # The op is HBM-bandwidth bound, so bf16 table storage (default) halves
        # streamed bytes; pass param_dtype=jnp.float32 to match the PyTorch
        # module's f32 storage exactly.  In-kernel accumulation is always f32.
        self.node_embeddings = xavier_uniform(
            k_node, node_vocab_size, node_embed_dim).astype(param_dtype)
        self.rela_embeddings = xavier_uniform(
            k_rela, rela_size, rela_embed_dim).astype(param_dtype)
        self.trans_score = trans_score
        self.embed_dim = node_embed_dim
        self.node_vocab = node_vocab_size
        self.rela_vocab = rela_size
        self.param_dtype = param_dtype

        # Fused-gather eligibility: the combined table must fit comfortably in
        # VMEM and the one-hot selection matmul must stay cheaper than the
        # streaming fallback (vocab-size heuristic).
        vtot = node_vocab_size + rela_size
        table_bytes = vtot * node_embed_dim * jnp.dtype(param_dtype).itemsize
        self._fused_ok = (vtot <= max_fused_vocab) and (table_bytes <= (4 << 20))
        if self._fused_ok:
            self.comb_emb_T = jnp.concatenate(
                [self.node_embeddings.T, self.rela_embeddings.T], axis=1)  # (D, Vn+Vr)
        else:
            self.comb_emb_T = None

        # NOTE: args.detach_kb_node only affects gradients (detach); forward
        # values are identical, so nothing to do here.
        # TODO(synk): self.emb_out (LogSoftmax) is defined in the PyTorch module
        # but never used in forward, so it is intentionally not ported.

    def __call__(self, tuples, *, row_tile=None, gather_mode="auto"):
        head_ids, tail_ids, rela_ids = tuples              # each (B, N) int
        B, N = head_ids.shape
        R = B * N
        D = self.embed_dim

        h_flat = head_ids.reshape(-1).astype(jnp.int32)
        t_flat = tail_ids.reshape(-1).astype(jnp.int32)
        r_flat = rela_ids.reshape(-1).astype(jnp.int32)

        use_fused = (self._fused_ok if gather_mode == "auto"
                     else gather_mode == "fused")
        use_fused = use_fused and (self.comb_emb_T is not None)

        if use_fused:
            scores = transe_scores_fused(
                self.comb_emb_T, h_flat, t_flat, r_flat,
                node_vocab=self.node_vocab, trans_score=self.trans_score,
                row_tile=row_tile)
            return scores.reshape(B, N)

        # Fallback: XLA row-gather in its natural (rows, D) layout -- pad only
        # the cheap id vectors (padded rows gather index 0 and are sliced off).
        itemsize = jnp.dtype(self.param_dtype).itemsize
        _, tile_budget = _tpu_vmem_budgets()
        if row_tile is None:
            row_tile = _pick_gathered_row_tile(D, itemsize, R, budget=tile_budget)
        r_pad = pl.cdiv(R, row_tile) * row_tile

        def pad(ids):
            return jnp.pad(ids, (0, r_pad - R)) if r_pad != R else ids

        heads = jnp.take(self.node_embeddings, pad(h_flat), axis=0)   # (r_pad, D)
        tails = jnp.take(self.node_embeddings, pad(t_flat), axis=0)
        relas = jnp.take(self.rela_embeddings, pad(r_flat), axis=0)
        scores = transe_scores_gathered(heads, tails, relas,
                                        trans_score=self.trans_score,
                                        row_tile=row_tile)
        return scores[:R].reshape(B, N)


# ----------------------------------------------------------------------------
# Pure-JAX reference and demo
# ----------------------------------------------------------------------------
def _reference_scores(model, tuples):
    head_ids, tail_ids, rela_ids = tuples
    heads = jnp.take(model.node_embeddings, head_ids, axis=0).astype(jnp.float32)
    tails = jnp.take(model.node_embeddings, tail_ids, axis=0).astype(jnp.float32)
    relas = jnp.take(model.rela_embeddings, rela_ids, axis=0).astype(jnp.float32)
    diff = heads + relas - tails
    if model.trans_score == "l1":
        return -jnp.sum(jnp.abs(diff), axis=2)
    return -jnp.sqrt(jnp.sum(diff * diff, axis=2))


if __name__ == "__main__":
    NODE_VOCAB = 16
    RELA_VOCAB = 4
    EMBED_DIM = 32

    key = jax.random.PRNGKey(0)
    k_model, k_h, k_t, k_r = jax.random.split(key, 4)

    def make_tuples(B, N):
        h = jax.random.randint(k_h, (B, N), 0, NODE_VOCAB, dtype=jnp.int32)
        t = jax.random.randint(k_t, (B, N), 0, NODE_VOCAB, dtype=jnp.int32)
        r = jax.random.randint(k_r, (B, N), 0, RELA_VOCAB, dtype=jnp.int32)
        return (h, t, r)

    ok = True
    tuples_small = make_tuples(2, 8)
    tuples_ragged = make_tuples(3, 100)        # R = 300 -> padded ids to 384

    # 1) f32 params, L2, fused-gather path (tables pinned in VMEM, MXU gather).
    model_l2 = RelaTransEModelPallas(NODE_VOCAB, EMBED_DIM, RELA_VOCAB, EMBED_DIM,
                                     trans_score="l2", param_dtype=jnp.float32,
                                     key=k_model)
    s = jax.block_until_ready(model_l2(tuples_small))
    ref = _reference_scores(model_l2, tuples_small)
    ok &= (s.shape == (2, 8)) and bool(jnp.allclose(s, ref, atol=1e-4, rtol=1e-4))

    # 2) f32 params, L1, ragged rows + explicit small row_tile (multi-step grid
    #    and id-padding path on the fused kernel).
    model_l1 = RelaTransEModelPallas(NODE_VOCAB, EMBED_DIM, RELA_VOCAB, EMBED_DIM,
                                     trans_score="l1", param_dtype=jnp.float32,
                                     key=k_model)
    s = jax.block_until_ready(model_l1(tuples_ragged, row_tile=128))
    ref_l1 = _reference_scores(model_l1, tuples_ragged)
    ok &= (s.shape == (3, 100)) and bool(jnp.allclose(s, ref_l1, atol=1e-4, rtol=1e-4))

    # 3) default bf16 params, fused path (halved HBM bytes, f32 accumulation).
    model_bf16 = RelaTransEModelPallas(NODE_VOCAB, EMBED_DIM, RELA_VOCAB, EMBED_DIM,
                                       trans_score="l2", key=k_model)
    s = jax.block_until_ready(model_bf16(tuples_small))
    ref_bf16 = _reference_scores(model_bf16, tuples_small)
    ok &= (s.shape == (2, 8)) and bool(jnp.allclose(s, ref_bf16, atol=1e-3, rtol=1e-3))

    # 4) forced XLA-gather fallback (large-vocab code path), bf16 params.
    s = jax.block_until_ready(model_bf16(tuples_small, gather_mode="xla"))
    ok &= (s.shape == (2, 8)) and bool(jnp.allclose(s, ref_bf16, atol=1e-3, rtol=1e-3))

    # 5) forced XLA-gather fallback, ragged rows, L1, f32 (multi-step grid).
    s = jax.block_until_ready(model_l1(tuples_ragged, gather_mode="xla",
                                       row_tile=128))
    ok &= (s.shape == (3, 100)) and bool(jnp.allclose(s, ref_l1, atol=1e-4, rtol=1e-4))

    print("KERNEL_OK" if ok else "MISMATCH")
</pallas_src>

<mosaic_0001>
module attributes {stable_mosaic.version = 11 : i64} {
  func.func @_fused_transe_kernel(%arg0: i32, %arg1: memref<32x20xf32, #tpu.memory_space<vmem>>, %arg2: memref<1x128xi32, #tpu.memory_space<vmem>>, %arg3: memref<1x128xi32, #tpu.memory_space<vmem>>, %arg4: memref<1x128xi32, #tpu.memory_space<vmem>>, %arg5: memref<1x128xf32, #tpu.memory_space<vmem>>) attributes {dimension_semantics = [#tpu.dimension_semantics<parallel>], iteration_bounds = array<i64: 1>, scalar_prefetch = 0 : i64, scratch_operands = 0 : i64, tpu.core_type = #tpu.core_type<tc>, window_params = [{pipeline_mode = #tpu.pipeline_mode<synchronous>, transform_indices = @transform_0, window_bounds = array<i64: 32, 20>}, {transform_indices = @transform_1, window_bounds = array<i64: 1, 128>}, {transform_indices = @transform_2, window_bounds = array<i64: 1, 128>}, {transform_indices = @transform_3, window_bounds = array<i64: 1, 128>}, {transform_indices = @transform_4, window_bounds = array<i64: 1, 128>}]} {
    %c0 = arith.constant 0 : index
    %c0_0 = arith.constant 0 : index
    %0 = vector.load %arg1[%c0, %c0_0] : memref<32x20xf32, #tpu.memory_space<vmem>>, vector<32x20xf32>
    %1 = tpu.iota {dimensions = array<i32: 0>} : vector<20x128xi32>
    %c0_1 = arith.constant 0 : index
    %c0_2 = arith.constant 0 : index
    %2 = vector.load %arg2[%c0_1, %c0_2] : memref<1x128xi32, #tpu.memory_space<vmem>>, vector<1x128xi32>
    %3 = vector.broadcast %2 : vector<1x128xi32> to vector<20x128xi32>
    %4 = arith.cmpi eq, %1, %3 : vector<20x128xi32>
    %5 = arith.extui %4 : vector<20x128xi1> to vector<20x128xi32>
    %6 = arith.sitofp %5 : vector<20x128xi32> to vector<20x128xf32>
    %c0_3 = arith.constant 0 : index
    %c0_4 = arith.constant 0 : index
    %7 = vector.load %arg3[%c0_3, %c0_4] : memref<1x128xi32, #tpu.memory_space<vmem>>, vector<1x128xi32>
    %8 = vector.broadcast %7 : vector<1x128xi32> to vector<20x128xi32>
    %9 = arith.cmpi eq, %1, %8 : vector<20x128xi32>
    %10 = arith.extui %9 : vector<20x128xi1> to vector<20x128xi32>
    %11 = arith.sitofp %10 : vector<20x128xi32> to vector<20x128xf32>
    %12 = arith.subf %6, %11 : vector<20x128xf32>
    %c0_5 = arith.constant 0 : index
    %c0_6 = arith.constant 0 : index
    %13 = vector.load %arg4[%c0_5, %c0_6] : memref<1x128xi32, #tpu.memory_space<vmem>>, vector<1x128xi32>
    %c16_i32 = arith.constant 16 : i32
    %14 = vector.broadcast %c16_i32 : i32 to vector<1x128xi32>
    %15 = arith.addi %13, %14 : vector<1x128xi32>
    %16 = vector.broadcast %15 : vector<1x128xi32> to vector<20x128xi32>
    %17 = arith.cmpi eq, %1, %16 : vector<20x128xi32>
    %18 = arith.extui %17 : vector<20x128xi1> to vector<20x128xi32>
    %19 = arith.sitofp %18 : vector<20x128xi32> to vector<20x128xf32>
    %20 = arith.addf %12, %19 : vector<20x128xf32>
    %cst = arith.constant dense<0.000000e+00> : vector<32x128xf32>
    %21 = tpu.matmul %0, %20, %cst {dimension_numbers = #tpu.dot_dimension_numbers<[1], [0], [0], [1], [0, 0, 1, 1], [], []>, precision = #tpu.contract_precision<fp32>} : vector<32x20xf32>, vector<20x128xf32>, vector<32x128xf32> -> vector<32x128xf32>
    %22 = arith.mulf %21, %21 : vector<32x128xf32>
    %cst_7 = arith.constant dense<0.000000e+00> : vector<128xf32>
    %23 = vector.multi_reduction <add>, %22, %cst_7 [0] : vector<32x128xf32> to vector<128xf32>
    %24 = vector.shape_cast %23 : vector<128xf32> to vector<1x128xf32>
    %25 = math.sqrt %24 : vector<1x128xf32>
    %cst_8 = arith.constant 0.000000e+00 : f32
    %26 = vector.broadcast %cst_8 : f32 to vector<1x128xf32>
    %27 = arith.subf %26, %25 : vector<1x128xf32>
    %c0_9 = arith.constant 0 : index
    %c0_10 = arith.constant 0 : index
    %28 = vector.load %arg5[%c0_9, %c0_10] : memref<1x128xf32, #tpu.memory_space<vmem>>, vector<1x128xf32>
    tpu.vector_store %arg5[%c0_9, %c0_10], %27 {strides = array<i32>} : memref<1x128xf32, #tpu.memory_space<vmem>>, vector<1x128xf32>,
    return
  }
  func.func @transform_0(%arg0: i32) -> (i32, i32) {
    %c0_i32 = arith.constant 0 : i32
    %c0_i32_0 = arith.constant 0 : i32
    %c0_i32_1 = arith.constant 0 : i32
    return %c0_i32, %c0_i32_0 : i32, i32
  }
  func.func @transform_1(%arg0: i32) -> (i32, i32) {
    %c0_i32 = arith.constant 0 : i32
    %c0_i32_0 = arith.constant 0 : i32
    return %c0_i32, %arg0 : i32, i32
  }
  func.func @transform_2(%arg0: i32) -> (i32, i32) {
    %c0_i32 = arith.constant 0 : i32
    %c0_i32_0 = arith.constant 0 : i32
    return %c0_i32, %arg0 : i32, i32
  }
  func.func @transform_3(%arg0: i32) -> (i32, i32) {
    %c0_i32 = arith.constant 0 : i32
    %c0_i32_0 = arith.constant 0 : i32
    return %c0_i32, %arg0 : i32, i32
  }
  func.func @transform_4(%arg0: i32) -> (i32, i32) {
    %c0_i32 = arith.constant 0 : i32
    %c0_i32_0 = arith.constant 0 : i32
    return %c0_i32, %arg0 : i32, i32
  }
}

</mosaic_0001>

<bundles_post_ra>
// kernel: tpu_custom_call.1
= control target key start
LH: loop header
LB: loop body
LE: loop exit
PB: predicated region body
PF: predicated region fallthrough
CT: control target
= control target key end

     0   :  { %v22_v0 = vlaneseq  ;;  %vm66_vm0 = vcmask 162816   ;;  %vm79_vm1 = vcmask 1043456   ;;  %s532_s0 = inlined_call_operand.vmem [shape: f32[32,20], index: 0, kind: input, shape index: {}]   ;;  %s533_s1 = inlined_call_operand.vmem [shape: s32[1,128], index: 1, kind: input, shape index: {}]   ;;  %s534_s2 = inlined_call_operand.vmem [shape: s32[1,128], index: 2, kind: input, shape index: {}]   ;;  %s535_s3 = inlined_call_operand.vmem [shape: s32[1,128], index: 3, kind: input, shape index: {}]   ;;  %s536_s4 = inlined_call_operand.hbm [shape: f32[1,128], index: 4, kind: output, shape index: {}]  }
   0x1   :  { %v408_v1 = vld [vmem:[%s533_s1] ss:$0 sm:$0xff]  ;;  %v20_v6 = vld [vmem:[%s532_s0 + $0x10] sm:$0xff]  ;;  %v21_v7 = vld [vmem:[%s532_s0 + $0x18] sm:$0xff] }
   0x2   :  { %v409_v2 = vld [vmem:[%s534_s2] ss:$0 sm:$0xff]  ;;  %v23_v4 = vshrl.u32 %v22_v0, 7  ;;  %v74_v9 = vsel %vm66_vm0, %v20_v6, 0  ;;  %v77_v10 = vsel %vm66_vm0, %v21_v7, 0 }
   0x3   :  { %v51_v3 = vld [vmem:[%s535_s3] sm:$0x1] }
   0x4   :  { %v52_v5 = vadd.s32 16, %v51_v3  ;;  %v18_v8 = vld [vmem:[%s532_s0] sm:$0xff] }
   0x5   :  { %v68_v11 = vsel %vm66_vm0, %v18_v8, 0 }
   0x6   :  { %9 = vsyncpa [#allocation3], 0  ;;  %v25_v12 = vadd.s32 16, %v23_v4  ;;  %v53_v13 = vperm.slane %v52_v5, 0  ;;  %v24_v14 = vadd.s32 8, %v23_v4  ;;  %vm28_vm2 = vcmp.eq.s32.totalorder %v23_v4, %v408_v1  ;;  %v19_v25 = vld [vmem:[%s532_s0 + $0x8] sm:$0xff] }
   0x7   :  { %v438_v15 = vmov 0.0   ;;  %vm39_vm3 = vcmp.eq.s32.totalorder %v23_v4, %v409_v2  ;;  %v486_v17 = vand.u32 4294901760, %v74_v9  ;;  %v488_v18 = vand.u32 4294901760, %v77_v10  ;;  %s439_s0 = smov [#allocation2]   ;;  %s382_s29 = sshll.u32 %s536_s4, 4  ;;  %s383_s29 = int_to_ptr.hbm [resolvable:$true] %s382_s29 }
   0x8   :  { %v391_v16 = vsel %vm28_vm2, 1.0, %v438_v15  ;;  %vm30_vm4 = vcmp.eq.s32.totalorder %v25_v12, %v408_v1  ;;  %vm41_vm5 = vcmp.eq.s32.totalorder %v25_v12, %v409_v2  ;;  %vm56_vm6 = vcmp.eq.s32.totalorder %v25_v12, %v53_v13  ;;  %s380_s26 = sshll.u32 %s439_s0, 4  ;;  %s381_s26 = int_to_ptr.vmem [resolvable:$true] %s380_s26 }
   0x9   :  { %vm29_vm7 = vcmp.eq.s32.totalorder %v24_v14, %v408_v1  ;;  %v393_v19 = vsel %vm30_vm4, 1.0, %v438_v15  ;;  %v396_v20 = vsel %vm41_vm5, 1.0, %v438_v15  ;;  %v399_v21 = vsel %vm56_vm6, 1.0, %v438_v15 }
   0xa   :  { %v392_v22 = vsel %vm29_vm7, 1.0, %v438_v15  ;;  %v50_v23 = vsub.f32 %v393_v19, %v396_v20  ;;  %vm40_vm8 = vcmp.eq.s32.totalorder %v24_v14, %v409_v2  ;;  %vm55_vm9 = vcmp.eq.s32.totalorder %v24_v14, %v53_v13 }
   0xb   :  { %v394_v24 = vsel %vm39_vm3, 1.0, %v438_v15  ;;  %v395_v26 = vsel %vm40_vm8, 1.0, %v438_v15  ;;  %v398_v27 = vsel %vm55_vm9, 1.0, %v438_v15  ;;  %vm54_vm10 = vcmp.eq.s32.totalorder %v23_v4, %v53_v13 }
   0xc   :  { %v48_v28 = vsub.f32 %v391_v16, %v394_v24  ;;  %v65_v29 = vadd.f32 %v399_v21, %v50_v23  ;;  %v49_v30 = vsub.f32 %v392_v22, %v395_v26  ;;  %v397_v31 = vsel %vm54_vm10, 1.0, %v438_v15 }
   0xd   :  { %v494_v32 = vsub.f32 %v74_v9, %v486_v17  ;;  %v497_v34 = vsub.f32 %v77_v10, %v488_v18  ;;  %v499_v35 = vand.u32 4294901760, %v68_v11  ;;  %v71_v36 = vsel %vm66_vm0, %v19_v25, 0 }
   0xe   :  { %v63_v33 = vadd.f32 %v397_v31, %v48_v28  ;;  %v81_v37 = vsel %vm79_vm1, %v65_v29, 0  ;;  %v64_v38 = vadd.f32 %v398_v27, %v49_v30  ;;  %v504_v40 = vand.u32 4294901760, %v71_v36 }
   0xf   :  { %v120_v39 = vand.u32 4294901760, %v494_v32  ;;  %v96_v41 = vand.u32 4294901760, %v81_v37  ;;  %v103_v43 = vsub.f32 %v68_v11, %v499_v35  ;;  %v128_v52 = vand.u32 4294901760, %v497_v34 }
  0x10   :  { %v100_v42 = vand.u32 4294901760, %v63_v33  ;;  %v98_v44 = vand.u32 4294901760, %v64_v38  ;;  %v111_v46 = vsub.f32 %v71_v36, %v504_v40 }
  0x11   :  { %v121_v45 = vsub.f32 %v494_v32, %v120_v39  ;;  %400 = vmatpush.msra.mxu2 %v96_v41  ;;  %v149_v47 = vsub.f32 %v81_v37, %v96_v41  ;;  %97 = vmatpush.msra.mxu0 %v96_v41  ;;  %v104_v49 = vand.u32 4294901760, %v103_v43  ;;  %v129_v62 = vsub.f32 %v497_v34, %v128_v52 }
  0x12   :  { %v161_v48 = vsub.f32 %v63_v33, %v100_v42  ;;  %v155_v51 = vsub.f32 %v64_v38, %v98_v44  ;;  %v112_v57 = vand.u32 4294901760, %v111_v46 }
  0x13   :  { %v122_v50 = vand.u32 4294901760, %v121_v45  ;;  %401 = vmatpush.msra.mxu2 %v98_v44  ;;  %v150_v53 = vand.u32 4294901760, %v149_v47  ;;  %99 = vmatpush.msra.mxu0 %v98_v44  ;;  %v105_v55 = vsub.f32 %v103_v43, %v104_v49  ;;  %v130_v3 = vand.u32 4294901760, %v129_v62 }
  0x14   :  { %v162_v54 = vand.u32 4294901760, %v161_v48  ;;  %v156_v56 = vand.u32 4294901760, %v155_v51  ;;  %v113_v1 = vsub.f32 %v111_v46, %v112_v57 }
  0x15   :  { %402 = vmatpush.msra.mxu2 %v100_v42  ;;  %v151_v58 = vsub.f32 %v149_v47, %v150_v53  ;;  %101 = vmatpush.msra.mxu0 %v100_v42  ;;  %v106_v60 = vand.u32 4294901760, %v105_v55 }
  0x16   :  { %v163_v59 = vsub.f32 %v161_v48, %v162_v54  ;;  %123 = vmatmul.f32.vlgmr.msra.gmra.mxu2 %v122_v50  ;;  %v157_v61 = vsub.f32 %v155_v51, %v156_v56  ;;  %v114_v4 = vand.u32 4294901760, %v113_v1 }
  0x17   :  { %286 = vmatpush.msrb.mxu0 %v150_v53  ;;  %v152_v63 = vand.u32 4294901760, %v151_v58  ;;  %198 = vmatpush.msrb.mxu2 %v149_v47 }
  0x18   :  { %107 = vmatmul.f32.vlgmr.msra.gmra.mxu0 %v106_v60  ;;  %v158_v0 = vand.u32 4294901760, %v157_v61  ;;  %v164_v2 = vand.u32 4294901760, %v163_v59 }
  0x19   :  { %290 = vmatpush.msrb.mxu0 %v156_v56  ;;  %403 = vmatpush.msra.mxu3 %v152_v63 }
  0x1a   :  { %153 = vmatpush.msra.mxu1 %v152_v63  ;;  %201 = vmatpush.msrb.mxu2 %v155_v51 }
  0x1b   :  { %294 = vmatpush.msrb.mxu0 %v162_v54  ;;  %404 = vmatpush.msra.mxu3 %v158_v0 }
  0x1c   :  { %159 = vmatpush.msra.mxu1 %v158_v0  ;;  %204 = vmatpush.msrb.mxu2 %v161_v48 }
  0x1d   :  { %405 = vmatpush.msra.mxu3 %v164_v2 }
  0x1e   :  { %165 = vmatpush.msra.mxu1 %v164_v2  ;;  %131 = vmatmul.f32.gmra.mxu2 %v130_v3 }
  0x1f   :  { %175 = vmatmul.f32.vlgmr.msra.gmra.mxu3 %v486_v17  ;;  %167 = vmatmul.f32.vlgmr.msra.gmra.mxu1 %v499_v35 }
  0x20   :  { %240 = vmatpush.msrb.mxu3 %v96_v41  ;;  %326 = vmatpush.msrb.mxu1 %v96_v41 }
  0x21   :  { %115 = vmatmul.f32.gmra.mxu0 %v114_v4 }
  0x22   :  { %242 = vmatpush.msrb.mxu3 %v98_v44  ;;  %328 = vmatpush.msrb.mxu1 %v98_v44 }
  0x24   :  { %244 = vmatpush.msrb.mxu3 %v100_v42  ;;  %330 = vmatpush.msrb.mxu1 %v100_v42 }
  0x26   :  { %207 = vmatmul.f32.vlgmr.msrb.gmra.mxu2 %v103_v43 }
  0x27   :  { %179 = vmatmul.f32.gmra.mxu3 %v488_v18  ;;  %171 = vmatmul.f32.gmra.mxu1 %v504_v40 }
  0x29   :  { %296 = vmatmul.f32.vlgmr.msrb.gmra.mxu0 %v499_v35 }
  0x2e   :  { %212 = vmatmul.f32.gmra.mxu2 %v111_v46 }
  0x2f   :  { %248 = vmatmul.f32.vlgmr.msrb.gmra.mxu3 %v104_v49  ;;  %332 = vmatmul.f32.vlgmr.msrb.gmra.mxu1 %v499_v35 }
  0x31   :  { %300 = vmatmul.f32.gmra.mxu0 %v504_v40 }
  0x36   :  { %217 = vmatmul.f32.gmra.mxu2 %v494_v32 }
  0x37   :  { %254 = vmatmul.f32.gmra.mxu3 %v112_v57  ;;  %336 = vmatmul.f32.gmra.mxu1 %v504_v40 }
  0x39   :  { %304 = vmatmul.f32.gmra.mxu0 %v486_v17 }
  0x3e   :  { %222 = vmatmul.f32.gmra.mxu2 %v497_v34 }
  0x3f   :  { %260 = vmatmul.f32.gmra.mxu3 %v120_v39  ;;  %340 = vmatmul.f32.gmra.mxu1 %v486_v17 }
  0x41   :  { %308 = vmatmul.f32.gmra.mxu0 %v488_v18 }
  0x47   :  { %266 = vmatmul.f32.gmra.mxu3 %v128_v52  ;;  %344 = vmatmul.f32.gmra.mxu1 %v488_v18 }
  0x95   :  { %v108_v5 = vpop.f32.mrf.mxu0 }
  0x99   :  { %v124_v6 = vpop.f32.mrf.mxu2 }
  0x9c   :  { %v168_v7 = vpop.f32.mrf.mxu1 }
  0x9d   :  { %v169_v24 = vadd.f32 %v168_v7, %v108_v5 }
  0x9e   :  { %v116_v8 = vpop.f32.mrf.mxu0 }
  0xa1   :  { %v132_v9 = vpop.f32.mrf.mxu2 }
  0xa2   :  { %v176_v10 = vpop.f32.mrf.mxu3 }
  0xa3   :  { %v177_v25 = vadd.f32 %v176_v10, %v124_v6 }
  0xa4   :  { %v172_v11 = vpop.f32.mrf.mxu1 }
  0xa5   :  { %v173_v22 = vadd.f32 %v172_v11, %v116_v8 }
  0xa6   :  { %v297_v14 = vpop.f32.mrf.mxu0 }
  0xa9   :  { %v208_v13 = vpop.f32.mrf.mxu2 }
  0xaa   :  { %v180_v12 = vpop.f32.mrf.mxu3  ;;  %v209_v26 = vadd.f32 %v208_v13, %v169_v24 }
  0xab   :  { %v181_v38 = vadd.f32 %v180_v12, %v132_v9 }
  0xac   :  { %v333_v15 = vpop.f32.mrf.mxu1 }
  0xae   :  { %v301_v20 = vpop.f32.mrf.mxu0 }
  0xb1   :  { %v213_v16 = vpop.f32.mrf.mxu2 }
  0xb2   :  { %v249_v19 = vpop.f32.mrf.mxu3  ;;  %v214_v18 = vadd.f32 %v213_v16, %v173_v22 }
  0xb3   :  { %v250_v29 = vadd.f32 %v249_v19, %v209_v26 }
  0xb4   :  { %v337_v17 = vpop.f32.mrf.mxu1 }
  0xb5   :  { %v298_v35 = vadd.f32 %v297_v14, %v250_v29 }
  0xb6   :  { %v305_v28 = vpop.f32.mrf.mxu0 }
  0xb7   :  { %v334_v40 = vadd.f32 %v333_v15, %v298_v35 }
  0xb9   :  { %v218_v23 = vpop.f32.mrf.mxu2  ;;  %v348_v48 = vmul.f32 %v334_v40, %v334_v40 }
  0xba   :  { %v255_v21 = vpop.f32.mrf.mxu3  ;;  %v219_v30 = vadd.f32 %v218_v23, %v177_v25 }
  0xbb   :  { %v256_v27 = vadd.f32 %v255_v21, %v214_v18 }
  0xbc   :  { %v341_v32 = vpop.f32.mrf.mxu1 }
  0xbd   :  { %v302_v33 = vadd.f32 %v301_v20, %v256_v27 }
  0xbe   :  { %v309_v44 = vpop.f32.mrf.mxu0 }
  0xbf   :  { %v338_v39 = vadd.f32 %v337_v17, %v302_v33 }
  0xc1   :  { %v223_v37 = vpop.f32.mrf.mxu2  ;;  %v349_v45 = vmul.f32 %v338_v39, %v338_v39 }
  0xc2   :  { %v261_v31 = vpop.f32.mrf.mxu3  ;;  %v224_v41 = vadd.f32 %v223_v37, %v181_v38 }
  0xc3   :  { %v262_v34 = vadd.f32 %v261_v31, %v219_v30  ;;  %v352_v51 = vadd.f32 %v349_v45, %v348_v48 }
  0xc4   :  { %v345_v47 = vpop.f32.mrf.mxu1 }
  0xc5   :  { %v306_v36 = vadd.f32 %v305_v28, %v262_v34 }
  0xc7   :  { %v342_v42 = vadd.f32 %v341_v32, %v306_v36 }
  0xc9   :  { %v350_v49 = vmul.f32 %v342_v42, %v342_v42 }
  0xca   :  { %v267_v43 = vpop.f32.mrf.mxu3 }
  0xcb   :  { %v268_v46 = vadd.f32 %v267_v43, %v224_v41  ;;  %v353_v53 = vadd.f32 %v352_v51, %v350_v49 }
  0xcd   :  { %v310_v50 = vadd.f32 %v309_v44, %v268_v46 }
  0xcf   :  { %v346_v52 = vadd.f32 %v345_v47, %v310_v50 }
  0xd1   :  { %v351_v54 = vmul.f32 %v346_v52, %v346_v52 }
  0xd3   :  { %v354_v55 = vadd.f32 %v353_v53, %v351_v54 }
  0xd5   :  { %v355_v56 = vrot.slane %v354_v55, 4 }
  0xd7   :  { %v356_v57 = vadd.f32 %v355_v56, %v354_v55 }
  0xd9   :  { %v357_v58 = vrot.slane %v356_v57, 2 }
  0xdb   :  { %v358_v59 = vadd.f32 %v357_v58, %v356_v57 }
  0xdd   :  { %v359_v60 = vrot.slane %v358_v59, 1 }
  0xdf   :  { %v360_v61 = vadd.f32 %v359_v60, %v358_v59 }
  0xe1   :  { %410 = vrsqrt.f32 %v360_v61  ;;  %vm368_vm11 = vcmp.eq.f32.partialorder %v360_v61, inf  ;;  %v371_v5 = vand.u32 2147483648, %v360_v61  ;;  %vm370_vm12 = vcmp.eq.f32.partialorder %v360_v61, 0.0 }
  0xe7   :  { %v411_v62 = vpop.eup %410 }
  0xe8   :  { %v362_v63 = vmul.f32 %v411_v62, %v360_v61 }
  0xea   :  { %v363_v0 = vmul.f32 %v411_v62, %v362_v63 }
  0xec   :  { %v364_v1 = vmul.f32 0.5, %v363_v0 }
  0xee   :  { %v365_v2 = vsub.f32 1.5, %v364_v1 }
  0xf0   :  { %v366_v3 = vmul.f32 %v411_v62, %v365_v2 }
  0xf2   :  { %v367_v4 = vmul.f32 %v366_v3, %v360_v61 }
  0xf4   :  { %v369_v6 = vsel %vm368_vm11, %v360_v61, %v367_v4 }
  0xf5   :  { %v372_v7 = vsel %vm370_vm12, %v371_v5, %v369_v6 }
  0xf6   :  { %v373_v8 = vsub.f32 0.0, %v372_v7 }
  0xf8   :  { %374 = vst [vmem:[#allocation2] sm:$0x1] %v373_v8 }
  0xf9   :  { %385 = dma.vmem_to_hbm [thread:$0]  %s381_s26, 16, %s383_s29, [#allocation3]  }
  0xfa   :  { %436 = dma.done.wait [#allocation3], 16  }
  0xfb   :  { %437 = vsyncadd [#allocation3], 4294967280 }
  0xfc   :  { %390 = vsyncpa [#allocation3], 1 }

</bundles_post_ra>
